<compile_context>
chip_gen: v7x
topology: tpu7x:2x2x1
jax: 0.10.0
libtpu: 0.0.40
codegen_flags: <defaults>
</compile_context>

<pallas_src>
import functools
import math

import jax
import jax.numpy as jnp
import numpy as np
from jax.experimental import pallas as pl
from jax.experimental.pallas import tpu as pltpu

NUM_SCALES = 4
KERNEL_SIZES = (3, 5, 7, 9)
KMAX = 9
MAXPAD = KMAX // 2
NUM_TAPS = sum(KERNEL_SIZES)          # 24 real (scale, tap) entries
SCALE_STARTS = (0, 3, 8, 15)          # first flat tap index of each scale
NUM_HEADS = 8
Q_TILE_CAP = 256                      # query-tile cap (use ~128 on v7x if VMEM-tight)
VMEM_LIMIT = 64 * 1024 * 1024


def _pick_q_tile(seq_len, cap=Q_TILE_CAP):
    if seq_len <= cap:
        return seq_len
    for t in range(cap, 7, -1):
        if seq_len % t == 0 and t % 8 == 0:
            return t
    return seq_len


# ---------------------------------------------------------------------------
# Kernel A: multi-scale Conv1d (k = 3,5,7,9, 'same' padding) + ReLU
#   grid = (B, NUM_TAPS); one [H, H] tap weight resident per step; the input row
#   is zero-padded inside the kernel into a VMEM scratch; per-scale f32 accumulators
#   live in VMEM and are finalized (bias + ReLU + bf16 cast) at the last tap.
# ---------------------------------------------------------------------------
def _conv_ms_kernel(x_ref, w_ref, b_ref, ms_ref, xpad_sc, acc_sc, *, seq_len):
    t = pl.program_id(1)

    @pl.when(t == 0)
    def _init():
        xpad_sc[...] = jnp.zeros_like(xpad_sc)
        xpad_sc[pl.ds(MAXPAD, seq_len), :] = x_ref[0].astype(xpad_sc.dtype)
        acc_sc[...] = jnp.zeros_like(acc_sc)

    # Decode flat tap index t -> (scale s, row offset into the padded buffer).
    # Scale s starts at flat index s*(s+2) and has pad s+1, so off = t - s^2 - 3s + 3.
    s = ((t >= SCALE_STARTS[1]).astype(jnp.int32)
         + (t >= SCALE_STARTS[2]).astype(jnp.int32)
         + (t >= SCALE_STARTS[3]).astype(jnp.int32))
    off = t - s * s - 3 * s + 3

    xs = xpad_sc[pl.ds(off, seq_len), :].astype(jnp.bfloat16)          # [S, H]
    contrib = jnp.dot(xs, w_ref[0], preferred_element_type=jnp.float32)

    for sc_idx in range(NUM_SCALES):                                   # static, predicated
        @pl.when(s == sc_idx)
        def _acc(sc_idx=sc_idx):
            acc_sc[sc_idx] = acc_sc[sc_idx] + contrib

    @pl.when(t == NUM_TAPS - 1)
    def _finalize():
        out = jnp.maximum(acc_sc[...] + b_ref[...], 0.0)               # [4, S, H] f32
        ms_ref[0] = out.astype(ms_ref.dtype)


def multi_scale_extract(x, w_flat, b_conv):
    B, S, H = x.shape
    kernel = functools.partial(_conv_ms_kernel, seq_len=S)
    return pl.pallas_call(
        kernel,
        out_shape=jax.ShapeDtypeStruct((B, NUM_SCALES, S, H), jnp.bfloat16),
        grid=(B, NUM_TAPS),
        in_specs=[
            pl.BlockSpec((1, S, H), lambda b, t: (b, 0, 0)),
            pl.BlockSpec((1, H, H), lambda b, t: (t, 0, 0)),
            pl.BlockSpec((NUM_SCALES, 1, H), lambda b, t: (0, 0, 0)),
        ],
        out_specs=pl.BlockSpec((1, NUM_SCALES, S, H), lambda b, t: (b, 0, 0, 0)),
        scratch_shapes=[
            pltpu.VMEM((S + 2 * MAXPAD, H), jnp.float32),   # in-kernel zero padding
            pltpu.VMEM((NUM_SCALES, S, H), jnp.float32),    # per-scale accumulators
        ],
        compiler_params=pltpu.CompilerParams(
            dimension_semantics=("parallel", "arbitrary"),
            vmem_limit_bytes=VMEM_LIMIT),
    )(x, w_flat, b_conv)


# ---------------------------------------------------------------------------
# Kernel B: cross-attention fusion (kdim=vdim=4H) + residual + LayerNorm + classifier
#   grid = (B, num_q_tiles); per-head K/V for the whole sequence are computed once
#   per batch row (qi == 0) into VMEM scratch; each step streams one Q tile through
#   attention + LayerNorm + classifier. Logits are stored lane-dense (padded to 128).
# ---------------------------------------------------------------------------
def _fusion_cls_kernel(base_ref, ms_ref, wq_ref, wk_ref, wv_ref, wo_ref,
                       bq_ref, bk_ref, bv_ref, bo_ref,
                       ln_g_ref, ln_b_ref, wc_ref, bc_ref,
                       logits_ref, k_sc, v_sc,
                       *, seq_len, hidden, num_heads, head_dim):
    f32, bf16 = jnp.float32, jnp.bfloat16
    qi = pl.program_id(1)

    # ---- build per-head K/V for the full sequence once per batch row ----
    @pl.when(qi == 0)
    def _build_kv():
        for h in range(num_heads):                              # static unroll
            k_acc = jnp.zeros((seq_len, head_dim), f32)
            v_acc = jnp.zeros((seq_len, head_dim), f32)
            for s in range(NUM_SCALES):                         # static unroll
                m_s = ms_ref[0, s]                              # (S, H) bf16
                k_acc = k_acc + jnp.dot(m_s, wk_ref[s, h], preferred_element_type=f32)
                v_acc = v_acc + jnp.dot(m_s, wv_ref[s, h], preferred_element_type=f32)
            k_sc[h] = (k_acc + bk_ref[h]).astype(k_sc.dtype)
            v_sc[h] = (v_acc + bv_ref[h]).astype(v_sc.dtype)

    base = base_ref[0]                                          # (TQ, H) bf16
    tq = base.shape[0]
    sm_scale = 1.0 / math.sqrt(head_dim)

    attn = jnp.zeros((tq, hidden), f32)
    for h in range(num_heads):                                  # static unroll
        qh = jnp.dot(base, wq_ref[h], preferred_element_type=f32) + bq_ref[h]
        qh = qh.astype(bf16)                                    # (TQ, hd)
        kh = k_sc[h]                                            # (S, hd) bf16
        vh = v_sc[h]                                            # (S, hd) bf16
        sc = jax.lax.dot_general(qh, kh, (((1,), (1,)), ((), ())),
                                 preferred_element_type=f32) * sm_scale   # (TQ, S)
        sc = sc - jnp.max(sc, axis=-1, keepdims=True)
        pexp = jnp.exp(sc)
        denom = jnp.sum(pexp, axis=-1, keepdims=True)
        pexp = pexp * pl.reciprocal(denom, approx=False)        # reciprocal, not divide
        oh = jnp.dot(pexp.astype(bf16), vh, preferred_element_type=f32)   # (TQ, hd)
        # output projection accumulated per head (folds the head concat away)
        attn = attn + jnp.dot(oh.astype(bf16), wo_ref[h], preferred_element_type=f32)
    attn = attn + bo_ref[...]

    # residual + LayerNorm (eps = 1e-5, nn.LayerNorm default) in f32
    x = base.astype(f32) + attn
    mean = jnp.mean(x, axis=-1, keepdims=True)
    var = jnp.mean(jnp.square(x - mean), axis=-1, keepdims=True)
    fused = (x - mean) * jax.lax.rsqrt(var + 1e-5) * ln_g_ref[...] + ln_b_ref[...]

    logits = jnp.dot(fused.astype(bf16), wc_ref[...],
                     preferred_element_type=f32) + bc_ref[...]
    logits_ref[0] = logits.astype(logits_ref.dtype)


def fusion_and_classify(base, ms, p, num_labels):
    B, S, H = base.shape
    nh = NUM_HEADS
    hd = H // nh
    lp = ((num_labels + 127) // 128) * 128                      # lane-dense logits
    tq = _pick_q_tile(S)
    nq = S // tq

    # host-side, zero-cost weight re-layouts (per-head split; padded classifier)
    wq_h = p["wq"].reshape(H, nh, hd).transpose(1, 0, 2)                      # (NH,H,hd)
    wk_h = p["wk"].reshape(NUM_SCALES, H, nh, hd).transpose(0, 2, 1, 3)       # (NS,NH,H,hd)
    wv_h = p["wv"].reshape(NUM_SCALES, H, nh, hd).transpose(0, 2, 1, 3)
    wo_h = p["wo"].reshape(nh, hd, H)                                         # (NH,hd,H)
    bq_h = p["bq"].reshape(nh, 1, hd)
    bk_h = p["bk"].reshape(nh, 1, hd)
    bv_h = p["bv"].reshape(nh, 1, hd)
    wc_pad = jnp.zeros((H, lp), p["wc"].dtype).at[:, :num_labels].set(p["wc"])
    bc_pad = jnp.zeros((1, lp), jnp.float32).at[:, :num_labels].set(p["bc"])

    kernel = functools.partial(_fusion_cls_kernel, seq_len=S, hidden=H,
                               num_heads=nh, head_dim=hd)
    full = lambda a: pl.BlockSpec(a.shape, lambda b, q: (0,) * a.ndim)

    logits_pad = pl.pallas_call(
        kernel,
        out_shape=jax.ShapeDtypeStruct((B, S, lp), jnp.float32),
        grid=(B, nq),
        in_specs=[
            pl.BlockSpec((1, tq, H), lambda b, q: (b, q, 0)),                 # Q tile
            pl.BlockSpec((1, NUM_SCALES, S, H), lambda b, q: (b, 0, 0, 0)),   # full ms
            full(wq_h), full(wk_h), full(wv_h), full(wo_h),
            full(bq_h), full(bk_h), full(bv_h), full(p["bo"]),
            full(p["ln_g"]), full(p["ln_b"]), full(wc_pad), full(bc_pad),
        ],
        out_specs=pl.BlockSpec((1, tq, lp), lambda b, q: (b, q, 0)),
        scratch_shapes=[pltpu.VMEM((nh, S, hd), jnp.bfloat16),    # K per head
                        pltpu.VMEM((nh, S, hd), jnp.bfloat16)],   # V per head
        compiler_params=pltpu.CompilerParams(
            dimension_semantics=("parallel", "arbitrary"),
            vmem_limit_bytes=VMEM_LIMIT),
    )(base, ms, wq_h, wk_h, wv_h, wo_h, bq_h, bk_h, bv_h, p["bo"],
      p["ln_g"], p["ln_b"], wc_pad, bc_pad)
    return logits_pad[..., :num_labels]


# ---------------------------------------------------------------------------
# Parameter construction (deterministic, synthetic) + full forward
# ---------------------------------------------------------------------------
def make_params(key, hidden, num_labels, vocab):
    ks = jax.random.split(key, 16)
    H = hidden
    f32, bf16 = jnp.float32, jnp.bfloat16
    # conv weights stored flat along the 24 (scale, tap) entries, channels-last [k,in,out]
    w_list = []
    for s, ksz in enumerate(KERNEL_SIZES):
        w_list.append(0.02 * jax.random.normal(jax.random.fold_in(ks[0], s),
                                               (ksz, H, H), f32))
    p = {
        "w_conv": jnp.concatenate(w_list, axis=0).astype(bf16),       # (24, H, H)
        "b_conv": 0.01 * jax.random.normal(ks[1], (NUM_SCALES, 1, H), f32),
        # attention projections stored as [in, out] (already transposed vs. PyTorch)
        "wq": (0.02 * jax.random.normal(ks[2], (H, H), f32)).astype(bf16),
        "wk": (0.02 * jax.random.normal(ks[3], (NUM_SCALES * H, H), f32)).astype(bf16),
        "wv": (0.02 * jax.random.normal(ks[4], (NUM_SCALES * H, H), f32)).astype(bf16),
        "wo": (0.02 * jax.random.normal(ks[5], (H, H), f32)).astype(bf16),
        "bq": 0.01 * jax.random.normal(ks[6], (1, H), f32),
        "bk": 0.01 * jax.random.normal(ks[7], (1, H), f32),
        "bv": 0.01 * jax.random.normal(ks[8], (1, H), f32),
        "bo": 0.01 * jax.random.normal(ks[9], (1, H), f32),
        "ln_g": jnp.ones((1, H), f32),
        "ln_b": jnp.zeros((1, H), f32),
        "wc": (0.02 * jax.random.normal(ks[10], (H, num_labels), f32)).astype(bf16),
        "bc": 0.01 * jax.random.normal(ks[11], (1, num_labels), f32),
        # backbone stand-in
        "emb": 0.02 * jax.random.normal(ks[12], (vocab, H), f32),
        "w_bbox": 0.02 * jax.random.normal(ks[13], (4, H), f32),
    }
    return p


def forward(input_ids, bbox, params, num_labels):
    # TODO(synk): the full LayoutLMv3Model transformer backbone has no clean single-kernel
    # Pallas equivalent; it is replaced by a deterministic embedding + bbox projection
    # producing `last_hidden_state`.
    seq = params["emb"][input_ids] + (bbox.astype(jnp.float32) / 1000.0) @ params["w_bbox"]
    seq = seq.astype(jnp.bfloat16)
    ms = multi_scale_extract(seq, params["w_conv"], params["b_conv"])
    return fusion_and_classify(seq, ms, params, num_labels)


# ---------------------------------------------------------------------------
# Pure-JAX reference (same math, same bf16 rounding points) for correctness check
# ---------------------------------------------------------------------------
def reference_forward(input_ids, bbox, p, num_labels):
    f32, bf16 = jnp.float32, jnp.bfloat16
    seq = (p["emb"][input_ids] + (bbox.astype(f32) / 1000.0) @ p["w_bbox"]).astype(bf16)
    B, S, H = seq.shape

    # multi-scale conv (channels-last), same tap order and f32 accumulation
    xpad = jnp.pad(seq, ((0, 0), (MAXPAD, MAXPAD), (0, 0)))
    scales = []
    idx = 0
    for s, ksz in enumerate(KERNEL_SIZES):
        pad = ksz // 2
        acc = jnp.zeros((B, S, H), f32)
        for j in range(ksz):
            off = MAXPAD - pad + j
            acc = acc + jnp.einsum("bsh,hc->bsc", xpad[:, off:off + S, :],
                                   p["w_conv"][idx], preferred_element_type=f32)
            idx += 1
        scales.append(jnp.maximum(acc + p["b_conv"][s][None], 0.0).astype(bf16))
    ms = jnp.stack(scales, axis=1)                                   # (B, 4, S, H) bf16

    # cross-attention fusion (kdim = vdim = 4H interpretation)
    q = jnp.einsum("bsh,hd->bsd", seq, p["wq"], preferred_element_type=f32) + p["bq"]
    k = jnp.zeros((B, S, H), f32)
    v = jnp.zeros((B, S, H), f32)
    for s in range(NUM_SCALES):
        k = k + jnp.einsum("bsh,hd->bsd", ms[:, s], p["wk"][s * H:(s + 1) * H],
                           preferred_element_type=f32)
        v = v + jnp.einsum("bsh,hd->bsd", ms[:, s], p["wv"][s * H:(s + 1) * H],
                           preferred_element_type=f32)
    k = k + p["bk"]
    v = v + p["bv"]

    hd = H // NUM_HEADS
    sm_scale = 1.0 / math.sqrt(hd)

    def split_heads(x):
        return x.astype(bf16).reshape(B, S, NUM_HEADS, hd).transpose(0, 2, 1, 3)

    qh, kh, vh = split_heads(q), split_heads(k), split_heads(v)
    sc = jnp.einsum("bhqd,bhkd->bhqk", qh, kh, preferred_element_type=f32) * sm_scale
    sc = sc - jnp.max(sc, axis=-1, keepdims=True)
    pr = jnp.exp(sc)
    pr = pr / jnp.sum(pr, axis=-1, keepdims=True)
    o = jnp.einsum("bhqk,bhkd->bhqd", pr.astype(bf16), vh, preferred_element_type=f32)
    o = o.transpose(0, 2, 1, 3).reshape(B, S, H)
    attn_out = jnp.einsum("bsh,hd->bsd", o.astype(bf16), p["wo"],
                          preferred_element_type=f32) + p["bo"]

    x = seq.astype(f32) + attn_out
    mean = x.mean(-1, keepdims=True)
    var = ((x - mean) ** 2).mean(-1, keepdims=True)
    fused = (x - mean) * jax.lax.rsqrt(var + 1e-5) * p["ln_g"] + p["ln_b"]
    logits = jnp.einsum("bsh,hl->bsl", fused.astype(bf16), p["wc"],
                        preferred_element_type=f32) + p["bc"]
    return logits


if __name__ == "__main__":
    B, S, H, NUM_LABELS, VOCAB = 2, 8, 32, 8, 50

    key = jax.random.PRNGKey(0)
    k_params, k_ids, k_bbox = jax.random.split(key, 3)
    params = make_params(k_params, H, NUM_LABELS, VOCAB)

    input_ids = jax.random.randint(k_ids, (B, S), 0, VOCAB, dtype=jnp.int32)
    bbox = jax.random.randint(k_bbox, (B, S, 4), 0, 1000, dtype=jnp.int32)

    logits = forward(input_ids, bbox, params, NUM_LABELS)
    jax.block_until_ready(logits)

    ref = reference_forward(input_ids, bbox, params, NUM_LABELS)
    np.testing.assert_allclose(np.asarray(logits), np.asarray(ref), rtol=1e-3, atol=1e-3)

    print("KERNEL_OK")
</pallas_src>

<mosaic_0001>
module attributes {stable_mosaic.version = 11 : i64} {
  func.func @_conv_ms_kernel(%arg0: i32, %arg1: i32, %arg2: memref<1x8x32xbf16, #tpu.memory_space<vmem>>, %arg3: memref<1x32x32xbf16, #tpu.memory_space<vmem>>, %arg4: memref<4x1x32xf32, #tpu.memory_space<vmem>>, %arg5: memref<1x4x8x32xbf16, #tpu.memory_space<vmem>>, %arg6: memref<16x32xf32, #tpu.memory_space<vmem>>, %arg7: memref<4x8x32xf32, #tpu.memory_space<vmem>>) attributes {dimension_semantics = [#tpu.dimension_semantics<parallel>, #tpu.dimension_semantics<arbitrary>], iteration_bounds = array<i64: 2, 24>, scalar_prefetch = 0 : i64, scratch_operands = 2 : i64, tpu.core_type = #tpu.core_type<tc>, window_params = [{transform_indices = @transform_0, window_bounds = array<i64: 1, 8, 32>}, {transform_indices = @transform_1, window_bounds = array<i64: 1, 32, 32>}, {pipeline_mode = #tpu.pipeline_mode<synchronous>, transform_indices = @transform_2, window_bounds = array<i64: 4, 1, 32>}, {transform_indices = @transform_3, window_bounds = array<i64: 1, 4, 8, 32>}]} {
    %c0_i32 = arith.constant 0 : i32
    %0 = arith.cmpi eq, %arg1, %c0_i32 : i32
    %1 = arith.extui %0 : i1 to i32
    %c0_i32_0 = arith.constant 0 : i32
    %2 = arith.cmpi ne, %1, %c0_i32_0 : i32
    scf.if %2 {
      %cst_13 = arith.constant 0.000000e+00 : f32
      %37 = vector.broadcast %cst_13 : f32 to vector<16x32xf32>
      %c0_14 = arith.constant 0 : index
      %c0_15 = arith.constant 0 : index
      %38 = vector.load %arg6[%c0_14, %c0_15] : memref<16x32xf32, #tpu.memory_space<vmem>>, vector<16x32xf32>
      tpu.vector_store %arg6[%c0_14, %c0_15], %37 {strides = array<i32>} : memref<16x32xf32, #tpu.memory_space<vmem>>, vector<16x32xf32>,
      %c0_16 = arith.constant 0 : index
      %c0_17 = arith.constant 0 : index
      %c0_18 = arith.constant 0 : index
      %39 = vector.load %arg2[%c0_16, %c0_17, %c0_18] : memref<1x8x32xbf16, #tpu.memory_space<vmem>>, vector<1x8x32xbf16>
      %40 = vector.shape_cast %39 : vector<1x8x32xbf16> to vector<8x32xbf16>
      %41 = arith.extf %40 : vector<8x32xbf16> to vector<8x32xf32>
      %c4 = arith.constant 4 : index
      %c0_19 = arith.constant 0 : index
      %42 = vector.load %arg6[%c4, %c0_19] : memref<16x32xf32, #tpu.memory_space<vmem>>, vector<8x32xf32>
      tpu.vector_store %arg6[%c4, %c0_19], %41 {strides = array<i32>} : memref<16x32xf32, #tpu.memory_space<vmem>>, vector<8x32xf32>,
      %cst_20 = arith.constant 0.000000e+00 : f32
      %43 = vector.broadcast %cst_20 : f32 to vector<4x8x32xf32>
      %c0_21 = arith.constant 0 : index
      %c0_22 = arith.constant 0 : index
      %c0_23 = arith.constant 0 : index
      %44 = vector.load %arg7[%c0_21, %c0_22, %c0_23] : memref<4x8x32xf32, #tpu.memory_space<vmem>>, vector<4x8x32xf32>
      tpu.vector_store %arg7[%c0_21, %c0_22, %c0_23], %43 {strides = array<i32>} : memref<4x8x32xf32, #tpu.memory_space<vmem>>, vector<4x8x32xf32>,
    } else {
    }
    %c3_i32 = arith.constant 3 : i32
    %3 = arith.cmpi sge, %arg1, %c3_i32 : i32
    %4 = arith.extui %3 : i1 to i32
    %c8_i32 = arith.constant 8 : i32
    %5 = arith.cmpi sge, %arg1, %c8_i32 : i32
    %6 = arith.extui %5 : i1 to i32
    %7 = arith.addi %4, %6 : i32
    %c15_i32 = arith.constant 15 : i32
    %8 = arith.cmpi sge, %arg1, %c15_i32 : i32
    %9 = arith.extui %8 : i1 to i32
    %10 = arith.addi %7, %9 : i32
    %11 = arith.muli %10, %10 : i32
    %12 = arith.subi %arg1, %11 : i32
    %c3_i32_1 = arith.constant 3 : i32
    %13 = arith.muli %c3_i32_1, %10 : i32
    %14 = arith.subi %12, %13 : i32
    %c3_i32_2 = arith.constant 3 : i32
    %15 = arith.addi %14, %c3_i32_2 : i32
    %16 = arith.index_cast %15 : i32 to index
    %c0 = arith.constant 0 : index
    %17 = vector.load %arg6[%16, %c0] : memref<16x32xf32, #tpu.memory_space<vmem>>, vector<8x32xf32>
    %18 = arith.truncf %17 : vector<8x32xf32> to vector<8x32xbf16>
    %c0_3 = arith.constant 0 : index
    %c0_4 = arith.constant 0 : index
    %c0_5 = arith.constant 0 : index
    %19 = vector.load %arg3[%c0_3, %c0_4, %c0_5] : memref<1x32x32xbf16, #tpu.memory_space<vmem>>, vector<1x32x32xbf16>
    %20 = vector.shape_cast %19 : vector<1x32x32xbf16> to vector<32x32xbf16>
    %cst = arith.constant dense<0.000000e+00> : vector<8x32xf32>
    %21 = tpu.matmul %18, %20, %cst {dimension_numbers = #tpu.dot_dimension_numbers<[1], [0], [0], [1], [0, 0, 1, 1], [], []>} : vector<8x32xbf16>, vector<32x32xbf16>, vector<8x32xf32> -> vector<8x32xf32>
    %c0_i32_6 = arith.constant 0 : i32
    %22 = arith.cmpi eq, %10, %c0_i32_6 : i32
    %23 = arith.extui %22 : i1 to i32
    %c0_i32_7 = arith.constant 0 : i32
    %24 = arith.cmpi ne, %23, %c0_i32_7 : i32
    scf.if %24 {
      %c0_13 = arith.constant 0 : index
      %c0_14 = arith.constant 0 : index
      %c0_15 = arith.constant 0 : index
      %37 = vector.load %arg7[%c0_13, %c0_14, %c0_15] : memref<4x8x32xf32, #tpu.memory_space<vmem>>, vector<1x8x32xf32>
      %38 = vector.shape_cast %37 : vector<1x8x32xf32> to vector<8x32xf32>
      %39 = arith.addf %38, %21 : vector<8x32xf32>
      %c0_16 = arith.constant 0 : index
      %c0_17 = arith.constant 0 : index
      %c0_18 = arith.constant 0 : index
      %40 = vector.load %arg7[%c0_16, %c0_17, %c0_18] : memref<4x8x32xf32, #tpu.memory_space<vmem>>, vector<1x8x32xf32>
      %41 = vector.shape_cast %40 : vector<1x8x32xf32> to vector<8x32xf32>
      %42 = vector.shape_cast %39 : vector<8x32xf32> to vector<1x8x32xf32>
      tpu.vector_store %arg7[%c0_16, %c0_17, %c0_18], %42 {strides = array<i32>} : memref<4x8x32xf32, #tpu.memory_space<vmem>>, vector<1x8x32xf32>,
    } else {
    }
    %c1_i32 = arith.constant 1 : i32
    %25 = arith.cmpi eq, %10, %c1_i32 : i32
    %26 = arith.extui %25 : i1 to i32
    %c0_i32_8 = arith.constant 0 : i32
    %27 = arith.cmpi ne, %26, %c0_i32_8 : i32
    scf.if %27 {
      %c1 = arith.constant 1 : index
      %c0_13 = arith.constant 0 : index
      %c0_14 = arith.constant 0 : index
      %37 = vector.load %arg7[%c1, %c0_13, %c0_14] : memref<4x8x32xf32, #tpu.memory_space<vmem>>, vector<1x8x32xf32>
      %38 = vector.shape_cast %37 : vector<1x8x32xf32> to vector<8x32xf32>
      %39 = arith.addf %38, %21 : vector<8x32xf32>
      %c1_15 = arith.constant 1 : index
      %c0_16 = arith.constant 0 : index
      %c0_17 = arith.constant 0 : index
      %40 = vector.load %arg7[%c1_15, %c0_16, %c0_17] : memref<4x8x32xf32, #tpu.memory_space<vmem>>, vector<1x8x32xf32>
      %41 = vector.shape_cast %40 : vector<1x8x32xf32> to vector<8x32xf32>
      %42 = vector.shape_cast %39 : vector<8x32xf32> to vector<1x8x32xf32>
      tpu.vector_store %arg7[%c1_15, %c0_16, %c0_17], %42 {strides = array<i32>} : memref<4x8x32xf32, #tpu.memory_space<vmem>>, vector<1x8x32xf32>,
    } else {
    }
    %c2_i32 = arith.constant 2 : i32
    %28 = arith.cmpi eq, %10, %c2_i32 : i32
    %29 = arith.extui %28 : i1 to i32
    %c0_i32_9 = arith.constant 0 : i32
    %30 = arith.cmpi ne, %29, %c0_i32_9 : i32
    scf.if %30 {
      %c2 = arith.constant 2 : index
      %c0_13 = arith.constant 0 : index
      %c0_14 = arith.constant 0 : index
      %37 = vector.load %arg7[%c2, %c0_13, %c0_14] : memref<4x8x32xf32, #tpu.memory_space<vmem>>, vector<1x8x32xf32>
      %38 = vector.shape_cast %37 : vector<1x8x32xf32> to vector<8x32xf32>
      %39 = arith.addf %38, %21 : vector<8x32xf32>
      %c2_15 = arith.constant 2 : index
      %c0_16 = arith.constant 0 : index
      %c0_17 = arith.constant 0 : index
      %40 = vector.load %arg7[%c2_15, %c0_16, %c0_17] : memref<4x8x32xf32, #tpu.memory_space<vmem>>, vector<1x8x32xf32>
      %41 = vector.shape_cast %40 : vector<1x8x32xf32> to vector<8x32xf32>
      %42 = vector.shape_cast %39 : vector<8x32xf32> to vector<1x8x32xf32>
      tpu.vector_store %arg7[%c2_15, %c0_16, %c0_17], %42 {strides = array<i32>} : memref<4x8x32xf32, #tpu.memory_space<vmem>>, vector<1x8x32xf32>,
    } else {
    }
    %c3_i32_10 = arith.constant 3 : i32
    %31 = arith.cmpi eq, %10, %c3_i32_10 : i32
    %32 = arith.extui %31 : i1 to i32
    %c0_i32_11 = arith.constant 0 : i32
    %33 = arith.cmpi ne, %32, %c0_i32_11 : i32
    scf.if %33 {
      %c3 = arith.constant 3 : index
      %c0_13 = arith.constant 0 : index
      %c0_14 = arith.constant 0 : index
      %37 = vector.load %arg7[%c3, %c0_13, %c0_14] : memref<4x8x32xf32, #tpu.memory_space<vmem>>, vector<1x8x32xf32>
      %38 = vector.shape_cast %37 : vector<1x8x32xf32> to vector<8x32xf32>
      %39 = arith.addf %38, %21 : vector<8x32xf32>
      %c3_15 = arith.constant 3 : index
      %c0_16 = arith.constant 0 : index
      %c0_17 = arith.constant 0 : index
      %40 = vector.load %arg7[%c3_15, %c0_16, %c0_17] : memref<4x8x32xf32, #tpu.memory_space<vmem>>, vector<1x8x32xf32>
      %41 = vector.shape_cast %40 : vector<1x8x32xf32> to vector<8x32xf32>
      %42 = vector.shape_cast %39 : vector<8x32xf32> to vector<1x8x32xf32>
      tpu.vector_store %arg7[%c3_15, %c0_16, %c0_17], %42 {strides = array<i32>} : memref<4x8x32xf32, #tpu.memory_space<vmem>>, vector<1x8x32xf32>,
    } else {
    }
    %c23_i32 = arith.constant 23 : i32
    %34 = arith.cmpi eq, %arg1, %c23_i32 : i32
    %35 = arith.extui %34 : i1 to i32
    %c0_i32_12 = arith.constant 0 : i32
    %36 = arith.cmpi ne, %35, %c0_i32_12 : i32
    scf.if %36 {
      %c0_13 = arith.constant 0 : index
      %c0_14 = arith.constant 0 : index
      %c0_15 = arith.constant 0 : index
      %37 = vector.load %arg7[%c0_13, %c0_14, %c0_15] : memref<4x8x32xf32, #tpu.memory_space<vmem>>, vector<4x8x32xf32>
      %c0_16 = arith.constant 0 : index
      %c0_17 = arith.constant 0 : index
      %c0_18 = arith.constant 0 : index
      %38 = vector.load %arg4[%c0_16, %c0_17, %c0_18] : memref<4x1x32xf32, #tpu.memory_space<vmem>>, vector<4x1x32xf32>
      %39 = vector.broadcast %38 : vector<4x1x32xf32> to vector<4x8x32xf32>
      %40 = arith.addf %37, %39 : vector<4x8x32xf32>
      %cst_19 = arith.constant 0.000000e+00 : f32
      %41 = vector.broadcast %cst_19 : f32 to vector<4x8x32xf32>
      %42 = arith.maximumf %40, %41 : vector<4x8x32xf32>
      %43 = arith.truncf %42 : vector<4x8x32xf32> to vector<4x8x32xbf16>
      %c0_20 = arith.constant 0 : index
      %c0_21 = arith.constant 0 : index
      %c0_22 = arith.constant 0 : index
      %c0_23 = arith.constant 0 : index
      %44 = vector.load %arg5[%c0_20, %c0_21, %c0_22, %c0_23] : memref<1x4x8x32xbf16, #tpu.memory_space<vmem>>, vector<1x4x8x32xbf16>
      %45 = vector.shape_cast %44 : vector<1x4x8x32xbf16> to vector<4x8x32xbf16>
      %46 = vector.shape_cast %43 : vector<4x8x32xbf16> to vector<1x4x8x32xbf16>
      tpu.vector_store %arg5[%c0_20, %c0_21, %c0_22, %c0_23], %46 {strides = array<i32>} : memref<1x4x8x32xbf16, #tpu.memory_space<vmem>>, vector<1x4x8x32xbf16>,
    } else {
    }
    return
  }
  func.func @transform_0(%arg0: i32, %arg1: i32) -> (i32, i32, i32) {
    %c0_i32 = arith.constant 0 : i32
    %c0_i32_0 = arith.constant 0 : i32
    %c0_i32_1 = arith.constant 0 : i32
    return %arg0, %c0_i32, %c0_i32_0 : i32, i32, i32
  }
  func.func @transform_1(%arg0: i32, %arg1: i32) -> (i32, i32, i32) {
    %c0_i32 = arith.constant 0 : i32
    %c0_i32_0 = arith.constant 0 : i32
    %c0_i32_1 = arith.constant 0 : i32
    return %arg1, %c0_i32, %c0_i32_0 : i32, i32, i32
  }
  func.func @transform_2(%arg0: i32, %arg1: i32) -> (i32, i32, i32) {
    %c0_i32 = arith.constant 0 : i32
    %c0_i32_0 = arith.constant 0 : i32
    %c0_i32_1 = arith.constant 0 : i32
    %c0_i32_2 = arith.constant 0 : i32
    return %c0_i32, %c0_i32_0, %c0_i32_1 : i32, i32, i32
  }
  func.func @transform_3(%arg0: i32, %arg1: i32) -> (i32, i32, i32, i32) {
    %c0_i32 = arith.constant 0 : i32
    %c0_i32_0 = arith.constant 0 : i32
    %c0_i32_1 = arith.constant 0 : i32
    %c0_i32_2 = arith.constant 0 : i32
    return %arg0, %c0_i32, %c0_i32_0, %c0_i32_1 : i32, i32, i32, i32
  }
}

</mosaic_0001>

<bundles_post_ra>
// kernel: tpu_custom_call.1
= control target key start
LH: loop header
LB: loop body
LE: loop exit
PB: predicated region body
PF: predicated region fallthrough
CT: control target
= control target key end

     0   :  { %s1353_s0 = inlined_call_operand.hbm [shape: bf16[2,8,32], index: 0, kind: input, shape index: {}]   ;;  %s1354_s1 = inlined_call_operand.hbm [shape: bf16[24,32,32], index: 1, kind: input, shape index: {}]   ;;  %s1355_s2 = inlined_call_operand.hbm [shape: f32[4,1,32], index: 2, kind: input, shape index: {}]   ;;  %s1356_s3 = inlined_call_operand.hbm [shape: bf16[2,4,8,32], index: 3, kind: output, shape index: {}]  }
   0x1   :  { %1366 = sst [smem:[#allocation20_spill]] %s1353_s0 }
   0x2   :  { %1367 = sst [smem:[#allocation21_spill]] %s1355_s2 }
   0x3   :  { %8 = vsyncpa [#allocation5], 0 }
   0x4   :  { %10 = vsyncpa [#allocation5 + $0x1], 0 }
   0x5   :  { %11 = vsyncpa [#allocation8], 0 }
   0x6   :  { %13 = vsyncpa [#allocation8 + $0x1], 0 }
   0x7   :  { %14 = vsyncpa [#allocation6], 0 }
   0x8   :  { %16 = vsyncpa [#allocation6 + $0x1], 0  ;;  %s988_s12 = smov 0   ;;  %s990_s13 = smov 0  }
   0x9   :  { %s992_s14 = smov 0   ;;  %s994_s15 = smov 0  }
   0xa   :  { %s996_s16 = smov 0   ;;  %s998_s17 = smov 0  }
   0xb   :  { %s1000_s18 = smov 0   ;;  %s1002_s19 = smov 0  }
   0xc   :  { %s1004_s20 = smov 0   ;;  %s1006_s21 = smov 0  }
   0xd   :  { %s1008_s22 = smov 0  }
   0xe LB: > { %1368 = sst [smem:[#allocation15_spill]] %s933_s17  ;;  %s1042_s23 = sadd.s32 4294967295, %s953_s22   ;;  %s953_s22 = sphi %s1008_s22, %s22_s22   ;;  %s949_s21 = sphi %s1006_s21, %s1398_s21   ;;  %s945_s20 = sphi %s1004_s20, %s1405_s20   ;;  %s941_s19 = sphi %s1002_s19, %s1396_s19   ;;  %s937_s18 = sphi %s1000_s18, %s1404_s18   ;;  %s933_s17 = sphi %s998_s17, %s1395_s17   ;;  %s929_s16 = sphi %s996_s16, %s1403_s16   ;;  %s925_s15 = sphi %s994_s15, %s1402_s15   ;;  %s921_s14 = sphi %s992_s14, %s1401_s14   ;;  %s917_s13 = sphi %s990_s13, %s1400_s13   ;;  %s913_s12 = sphi %s988_s12, %s1399_s12  }
   0xf   : > { %1369 = sst [smem:[#allocation16_spill]] %s949_s21  ;;  %p80_p0 = scmp.ne.s32.totalorder %s917_s13, %s913_s12 }
  0x10   : > { %p1357_p1 = scmp.eq.s32.totalorder %s1042_s23, 0  ;;  %p561_p2 = scmp.ge.s32.totalorder %s953_s22, 1 }
  0x11   : > { %p138_p3 = scmp.lt.s32.totalorder %s953_s22, 49  ;;  %s955_s26 = smov [#allocation9]  }
  0x12   : > { %p1050_p4 = por %p80_p0, %p1357_p1  ;;  %s150_s27 = sshll.u32 %s955_s26, 4  ;;  %s151_s27 = int_to_ptr.vmem [resolvable:$true] %s150_s27 }
  0x13   : > { %p1054_p5 = pnand %p561_p2, %p138_p3  ;;  %s1373_s2 = sld [smem:[#allocation21_spill]] }
  0x14   : > { %s1370_s24 = scalar_select %p1050_p4, 1, 0 }
  0x15   : > { %s1371_s25 = scalar_select %p1054_p5, 1, 0 }
  0x16   : > { %p616_p6 = pneg %p1054_p5 }
  0x18   : > { %p1062_p7 = pnand %p616_p6, %p1357_p1 }
  0x19   : > { %s735_s4 = scalar_lea.hbm %s1373_s2, 64 }
  0x1a   : > { %p736_p8 = scmp.ne.s32.totalorder %s1373_s2, %s735_s4  ;;  %p737_p9 = pneg %p1062_p7 }
  0x1b   : > { %p742_p12 = scmp.lt.u32.totalorder %s735_s4, %s1373_s2 }
  0x1c   : > { %p738_p10 = pnand %p737_p9, %p736_p8 }
  0x1e   : > { %p739_p11 = pneg %p738_p10 }
  0x20   : > { %p744_p13 = pnand %p742_p12, %p739_p11 }
  0x22   : > { %747 = shalt.err (!%p744_p13)
}
  0x23   : > { %s748_s9 = scalar_lea.vmem %s151_s27, 64  ;;  %p756_p6 = scmp.lt.s32.totalorder %s151_s27, %s151_s27 }
  0x24   : > { %p749_p0 = scmp.ne.s32.totalorder %s151_s27, %s748_s9  ;;  %p757_p1 = scmp.lt.s32.totalorder %s748_s9, %s748_s9 }
  0x26   : > { %p751_p2 = pnand %p749_p0, %p737_p9  ;;  %p758_p4 = por %p757_p1, %p756_p6 }
  0x28   : > { %p752_p3 = pneg %p751_p2 }
  0x2a   : > { %p759_p5 = pnand %p758_p4, %p752_p3 }
  0x2c   : > { %762 = shalt.err (!%p759_p5)
}
  0x2d   : > { %s956_s10 = smov 16   ;;  %s957_s11 = smov 1  }
  0x2e   : > { %619 = dma.hbm_to_vmem [thread:$0]  (!%p1062_p7), %s1373_s2, 64, %s151_s27, [#allocation8], %s956_s10, %s956_s10, %s957_s11  }
  0x2f   : > { %s560_s29 = sadd.s32 4294967294, %s953_s22   ;;  %s31_s30 = sadd.s32 1, %s945_s20 }
  0x30   : > { %s34_s4 = sadd.s32 1, %s949_s21  ;;  %p32_p1 = scmp.ge.s32.totalorder %s31_s30, 24 }
  0x31   : > { %s41_s5 = sadd.s32 1, %s933_s17  ;;  %p48_p4 = scmp.ne.s32.totalorder %s933_s17, %s929_s16 }
  0x32   : > { %p49_p5 = scmp.eq.s32.totalorder %s953_s22, 0  ;;  %s1407_s30 = smov (%p32_p1, %s31_s30), 0 }
  0x33   : > { %1374 = sst [smem:[#allocation17_spill]] %s1407_s30  ;;  %s1409_s4 = smov (!%p32_p1, %s34_s4), %s949_s21 }
  0x34   : > { %p1097_p7 = por %p49_p5, %p48_p4  ;;  %p54_p8 = scmp.ne.s32.totalorder %s929_s16, %s925_s15 }
  0x35   : > { %p36_p9 = scmp.ge.s32.totalorder %s1409_s4, 2  ;;  %s64_s28 = ssub.s32 %s945_s20, %s1407_s30 }
  0x36   : > { %p1376_p10 = scmp.eq.s32.totalorder %s1042_s23, 0  ;;  %p65_p12 = scmp.eq.s32.totalorder %s64_s28, 0 }
  0x37   : > { %s1411_s4 = smov (%p36_p9, %s1409_s4), 0  ;;  %s67_s7 = sadd.s32 1, %s921_s14 }
  0x38   : > { %p1110_p11 = por %p1376_p10, %p54_p8  ;;  %1378 = sst [smem:[#allocation18_spill]] %s1411_s4 }
  0x39   : > { %p74_p13 = scmp.ne.s32.totalorder %s921_s14, %s917_s13  ;;  %s38_s8 = ssub.s32 %s949_s21, %s1411_s4 }
  0x3a   : > { %s1377_s6 = scalar_select %p1110_p11, 1, 0 }
  0x3b   : > { %p125_p0 = scmp.eq.s32.totalorder %s1042_s23, 47  ;;  %p39_p2 = scmp.eq.s32.totalorder %s38_s8, 0 }
  0x3c   : > { %p1124_p3 = por %p74_p13, %p49_p5  ;;  %p131_p1 = scmp.eq.s32.totalorder %s560_s29, 47 }
  0x3d   : > { %s1129_s10 = scalar_select %p65_p12, %s921_s14, %s67_s7  }
  0x3e   : > { %s1132_s11 = scalar_select %p39_p2, %s933_s17, %s41_s5  }
  0x3f   : > { %p1137_p6 = por %p125_p0, %p48_p4  ;;  %p632_p9 = scmp.lt.s32.totalorder %s953_s22, 48 }
  0x40   : > { %1380 = sst [smem:[#allocation19_spill]] %s1132_s11  ;;  %s164_s26 = sand.u32 1, %s933_s17  }
  0x41   : > { %s1381_s12 = scalar_select %p1137_p6, 1, 0 }
  0x42   : > { %p1146_p10 = por %p131_p1, %p54_p8  ;;  %s564_s8 = sshll.u32 %s164_s26, 2 }
  0x43   : > { %s565_s2 = sshll.u32 %s949_s21, 6  ;;  %s1383_s0 = sld [smem:[#allocation20_spill]] }
  0x44   : > { %s1382_s28 = scalar_select %p1146_p10, 1, 0 }
  0x45   : > { %s168_s30 = scalar_lea.vmem [#allocation4], %s564_s8  ;;  %p1158_p4 = pnand %p632_p9, %p1097_p7 }
  0x46   : > { %s175_s29 = sshll.u32 %s168_s30, 4  ;;  %p1166_p5 = pnand %p632_p9, %p1124_p3  ;;  %s1162_s29 = int_to_ptr.vmem [resolvable:$true] %s175_s29 }
  0x47   : > { %s165_s7 = scalar_lea.sflag [#allocation5], %s164_s26  ;;  %p765_p12 = pneg %p1158_p4 }
  0x49   : > { %s1154_s5 = scalar_lea.hbm %s1383_s0, %s565_s2  ;;  %s768_s8 = scalar_lea.hbm %s1383_s0, 128 }
  0x4a   : > { %s763_s21 = scalar_lea.hbm %s1154_s5, 64  ;;  %p769_p0 = scmp.lt.u32.totalorder %s1154_s5, %s1383_s0 }
  0x4b   : > { %p764_p8 = scmp.ne.s32.totalorder %s1154_s5, %s763_s21  ;;  %p770_p2 = scmp.lt.u32.totalorder %s768_s8, %s763_s21 }
  0x4c   : > { %p772_p1 = scmp.lt.u32.totalorder %s763_s21, %s1154_s5 }
  0x4d   : > { %p766_p7 = pnand %p765_p12, %p764_p8  ;;  %p771_p3 = por %p770_p2, %p769_p0 }
  0x4f   : > { %p767_p13 = pneg %p766_p7  ;;  %p773_p9 = por %p772_p1, %p771_p3 }
  0x51   : > { %p774_p10 = pnand %p773_p9, %p767_p13 }
  0x53   : > { %777 = shalt.err (!%p774_p10)
}
  0x54   : > { %s778_s26 = scalar_lea.vmem %s1162_s29, 64  ;;  %s958_s30 = smov [#allocation4]  }
  0x55   : > { %p779_p8 = scmp.ne.s32.totalorder %s1162_s29, %s778_s26  ;;  %s783_s27 = sshll.u32 %s958_s30, 4  ;;  %s784_s27 = int_to_ptr.vmem [resolvable:$false] %s783_s27 }
  0x56   : > { %s785_s17 = scalar_lea.vmem %s784_s27, 128  ;;  %p786_p11 = scmp.lt.s32.totalorder %s1162_s29, %s784_s27 }
  0x57   : > { %p781_p7 = pnand %p779_p8, %p765_p12  ;;  %p787_p0 = scmp.lt.s32.totalorder %s785_s17, %s778_s26 }
  0x59   : > { %p782_p6 = pneg %p781_p7  ;;  %p788_p2 = por %p787_p0, %p786_p11 }
  0x5b   : > { %p789_p3 = pnand %p788_p2, %p782_p6 }
  0x5d   : > { %792 = shalt.err (!%p789_p3)
}
  0x5e   : > { %623 = dma.hbm_to_vmem [thread:$0]  (!%p1158_p4), %s1154_s5, 64, %s1162_s29, %s165_s7  }
  0x5f   : > { %s184_s21 = sand.u32 1, %s921_s14   ;;  %s593_s8 = sshll.u32 %s945_s20, 8 }
  0x60   : > { %s566_s9 = sshll.u32 %s184_s21, 4  ;;  %s1201_s26 = scalar_lea.hbm %s1354_s1, %s593_s8 }
  0x61   : > { %s186_s11 = scalar_lea.vmem [#allocation7], %s566_s9  ;;  %s1386_s17 = sand.u32 1, %s953_s22  }
  0x62   : > { %s193_s27 = sshll.u32 %s186_s11, 4  ;;  %s1207_s0 = scalar_lea.sflag [#allocation8], %s1386_s17  ;;  %s1203_s27 = int_to_ptr.vmem [resolvable:$true] %s193_s27 }
  0x63   : > { %s793_s5 = scalar_lea.hbm %s1201_s26, 256  ;;  %p795_p6 = pneg %p1166_p5 }
  0x64   : > { %p794_p11 = scmp.ne.s32.totalorder %s1201_s26, %s793_s5  ;;  %s798_s7 = scalar_lea.hbm %s1354_s1, 6144 }
  0x65   : > { %p799_p12 = scmp.lt.u32.totalorder %s1201_s26, %s1354_s1  ;;  %p800_p13 = scmp.lt.u32.totalorder %s798_s7, %s793_s5 }
  0x66   : > { %p796_p10 = pnand %p795_p6, %p794_p11  ;;  %p802_p9 = scmp.lt.u32.totalorder %s793_s5, %s1201_s26 }
  0x67   : > { %p801_p1 = por %p800_p13, %p799_p12 }
  0x68   : > { %p797_p4 = pneg %p796_p10 }
  0x69   : > { %p803_p8 = por %p802_p9, %p801_p1 }
  0x6b   : > { %p804_p7 = pnand %p803_p8, %p797_p4 }
  0x6d   : > { %807 = shalt.err (!%p804_p7)
}
  0x6e   : > { %s808_s9 = scalar_lea.vmem %s1203_s27, 256  ;;  %s959_s30 = smov [#allocation7]  }
  0x6f   : > { %p809_p0 = scmp.ne.s32.totalorder %s1203_s27, %s808_s9  ;;  %s813_s11 = sshll.u32 %s959_s30, 4  ;;  %s814_s11 = int_to_ptr.vmem [resolvable:$false] %s813_s11 }
  0x70   : > { %s815_s17 = scalar_lea.vmem %s814_s11, 512  ;;  %p816_p11 = scmp.lt.s32.totalorder %s1203_s27, %s814_s11 }
  0x71   : > { %p811_p2 = pnand %p809_p0, %p795_p6  ;;  %p817_p10 = scmp.lt.s32.totalorder %s815_s17, %s808_s9 }
  0x73   : > { %p812_p3 = pneg %p811_p2  ;;  %p818_p12 = por %p817_p10, %p816_p11 }
  0x75   : > { %p819_p13 = pnand %p818_p12, %p812_p3 }
  0x77   : > { %822 = shalt.err (!%p819_p13)
}
  0x78   : > { %s960_s5 = smov 64   ;;  %s961_s29 = smov 4  }
  0x79   : > { %626 = dma.hbm_to_vmem [thread:$0]  (!%p1166_p5), %s1201_s26, 256, %s1203_s27, %s1207_s0, %s960_s5, %s960_s5, %s961_s29  }
  0x7a   : > { %p1387_p6 = scmp.ne.s32.totalorder %s1371_s25, 0 }
  0x7b   : > { %s1238_s2 = sand.u32 (!%p1387_p6), 1, %s929_s16   ;;  %p1388_p4 = scmp.ne.s32.totalorder (!%p1387_p6), %s1377_s6, 0 }
  0x7c   : > { %205 = sbr.rel (%p1387_p6) target bundleno = 443 (0x1bb), region = 32  ;;  %s570_s7 = sshll.u32 (!%p1387_p6), %s1238_s2, 2 }
  0x7d   : > { %s208_s21 = scalar_lea.sflag (!%p1387_p6), [#allocation5], %s1238_s2  ;;  %s211_s8 = scalar_lea.vmem (!%p1387_p6), [#allocation4], %s570_s7 }
  0x83   : > { %896 = dma.done.wait (%p1388_p4), %s208_s21, 64  }
  0x84   : > { %898 = vsyncadd (%p1388_p4), %s208_s21, 4294967232  ;;  %s216_s0 = sand.u32 1, %s1042_s23   ;;  %s218_s25 = sand.u32 1, %s917_s13  }
  0x85   : > { %s571_s4 = sshll.u32 %s218_s25, 4  ;;  %s217_s26 = scalar_lea.sflag [#allocation8], %s216_s0 }
  0x86   : > { %s220_s27 = scalar_lea.vmem [#allocation7], %s571_s4  ;;  %p1389_p5 = scmp.ne.s32.totalorder %s1370_s24, 0 }
  0x88   : > { %900 = dma.done.wait (%p1389_p5), %s217_s26, 256  }
  0x89   : > { %902 = vsyncadd (%p1389_p5), %s217_s26, 4294967040  ;;  %p1390_p1 = scmp.eq.s32.totalorder %s1042_s23, 0 }
  0x8b   : > { %904 = dma.done.wait (%p1390_p1), [#allocation8], 64   ;;  %p1391_p9 = pmov %p1390_p1 }
  0x8c   : > { %s573_s6 = sshll.u32 %s1238_s2, 4  ;;  %p574_p8 = scmp.ne.s32.totalorder %s937_s18, 0 }
  0x8d   : > { %906 = vsyncadd (%p1391_p9), [#allocation8], 4294967232  ;;  %s1257_s9 = scalar_lea.vmem [#allocation10], %s573_s6  ;;  %vm257_vm0 = vcmask (!%p574_p8), 261120   ;;  %v260_v0 = vld [vmem:[%s211_s8] sm:$0xf] (!%p574_p8) }
  0x8e   : > { %256 = sbr.rel (%p574_p8) target bundleno = 149 (0x95), region = 48  ;;  %v962_v1 = vmov (!%p574_p8), 0.0   ;;  %v261_v2 = vunpack.c.l.bf16 (!%p574_p8), %v260_v0 }
  0x8f   : > { %258 = vst.msk [vmem:[#allocation2] sm:$0xff] (!%p574_p8), %vm257_vm0, %v962_v1  ;;  %259 = vst.msk [vmem:[#allocation2 + $0x8] sm:$0xff] (!%p574_p8), %vm257_vm0, %v962_v1 }
  0x90   : > { %263 = vst.msk [vmem:[#allocation3] sm:$0xff] (!%p574_p8), %vm257_vm0, %v962_v1  ;;  %264 = vst.msk [vmem:[#allocation3 + $0x8] sm:$0xff] (!%p574_p8), %vm257_vm0, %v962_v1 }
  0x91   : > { %265 = vst.msk [vmem:[#allocation3 + $0x10] sm:$0xff] (!%p574_p8), %vm257_vm0, %v962_v1  ;;  %266 = vst.msk [vmem:[#allocation3 + $0x18] sm:$0xff] (!%p574_p8), %vm257_vm0, %v962_v1 }
  0x92   : > { %262 = vst.msk [vmem:[#allocation2 + $0x4] sm:$0xff] (!%p574_p8), %vm257_vm0, %v261_v2 }
  0x95 PF: > { %v733_v3 = vld [vmem:[%s220_s27] sm:$0xff]   ;;  %v963_v4 = vmov 0.0   ;;  %v734_v5 = vld [vmem:[%s220_s27 + $0x8] sm:$0xff]   ;;  %vm964_vm1 = vmmov 0   ;;  %p267_p7 = scmp.ge.s32.totalorder %s937_s18, 3  ;;  %p269_p0 = scmp.ge.s32.totalorder %s937_s18, 8 }
  0x96   : > { %598 = vmatprep.subr.bf16.mxu0 %v963_v4  ;;  %602 = vmatprep.mubr.msk.bf16.mxu0 %vm964_vm1, %v963_v4  ;;  %p272_p2 = scmp.ge.s32.totalorder %s937_s18, 15  ;;  %vm299_vm2 = vcmask 261120  }
  0x97   : > { %599 = vmatpush3.bf16.msra.mxu0 %v733_v3  ;;  %s268_s23 = scalar_select %p267_p7, 1, 0 }
  0x98   : > { %600 = vmatprep.subr.bf16.mxu0 %v963_v4  ;;  %s270_s24 = scalar_select %p269_p0, 1, 0 }
  0x99   : > { %s273_s30 = scalar_select %p272_p2, 1, 0 }
  0x9a   : > { %s271_s11 = sadd.s32 %s270_s24, %s268_s23 }
  0x9b   : > { %601 = vmatpush3.bf16.msra.mxu0 %v734_v5  ;;  %s1263_s17 = sadd.s32 %s273_s30, %s271_s11 }
  0x9c   : > { %s275_s5 = smul.u32 %s1263_s17, %s1263_s17  ;;  %p579_p3 = scmp.ne.s32.totalorder %s1263_s17, 0 }
  0x9d   : > { %s277_s29 = smul.u32 3, %s1263_s17  ;;  %v347_v12 = vld [vmem:[#allocation3] sm:$0xff] (!%p579_p3) }
  0x9e   : > { %s276_s7 = ssub.s32 %s937_s18, %s275_s5 }
  0x9f   : > { %s278_s21 = ssub.s32 %s276_s7, %s277_s29 }
  0xa0   : > { %s496_s8 = scalar_lea.vmem [#allocation2], %s278_s21 }
  0xa1   : > { %v575_v6 = vld [vmem:[%s496_s8 + $0x3] sm:$0xff] }
  0xa2   : > { %v282_v7 = vpack.c.bf16 %v575_v6, %v575_v6 }
  0xa4   : > { %603 = vmatmul.mubr.msk.bf16.vlgmr.msra.gmra.mrb[0].mxu0 %vm299_vm2, %v282_v7 }
 0x174   : > { %346 = sbr.rel (%p579_p3) target bundleno = 379 (0x17b), region = 52 }
 0x177   : > { %v337_v8 = vpop.f32.mrb[0].mxu0 }
 0x178   : > { %v604_v9 = vpop.f32.mrb[1].mxu0  ;;  %v348_v13 = vadd.f32 (!%p579_p3), %v347_v12, %v337_v8 }
 0x179   : > { %v340_v10 = vpop.f32.mrb[2].mxu0 }
 0x17a   : > { %v605_v11 = vpop.f32.mrb[3].mxu0  ;;  %349 = vst.msk [vmem:[#allocation3] sm:$0xff] (!%p579_p3), %vm299_vm2, %v348_v13 }
 0x17b PF: > { %p580_p11 = scmp.ne.s32.totalorder %s1263_s17, 1 }
 0x17c   : > { %v355_v14 = vld [vmem:[#allocation3 + $0x8] sm:$0xff] (!%p580_p11) }
 0x17d   : > { %353 = sbr.rel (%p580_p11) target bundleno = 388 (0x184), region = 56  ;;  %v356_v15 = vadd.f32 (!%p580_p11), %v355_v14, %v337_v8 }
 0x17f   : > { %357 = vst.msk [vmem:[#allocation3 + $0x8] sm:$0xff] (!%p580_p11), %vm299_vm2, %v356_v15 }
 0x184 PF: > { %p581_p10 = scmp.ne.s32.totalorder %s1263_s17, 2 }
 0x185   : > { %v363_v16 = vld [vmem:[#allocation3 + $0x10] sm:$0xff] (!%p581_p10) }
 0x186   : > { %361 = sbr.rel (%p581_p10) target bundleno = 397 (0x18d), region = 60  ;;  %v364_v17 = vadd.f32 (!%p581_p10), %v363_v16, %v337_v8 }
 0x188   : > { %365 = vst.msk [vmem:[#allocation3 + $0x10] sm:$0xff] (!%p581_p10), %vm299_vm2, %v364_v17 }
 0x18d PF: > { %p582_p12 = scmp.ne.s32.totalorder %s1263_s17, 3 }
 0x18e   : > { %v371_v18 = vld [vmem:[#allocation3 + $0x18] sm:$0xff] (!%p582_p12) }
 0x18f   : > { %369 = sbr.rel (%p582_p12) target bundleno = 406 (0x196), region = 64  ;;  %v372_v19 = vadd.f32 (!%p582_p12), %v371_v18, %v337_v8 }
 0x191   : > { %373 = vst.msk [vmem:[#allocation3 + $0x18] sm:$0xff] (!%p582_p12), %vm299_vm2, %v372_v19 }
 0x196 PF: > { %p583_p13 = scmp.ne.s32.totalorder %s937_s18, 23 }
 0x197   : > { %v378_v20 = vld [vmem:[#allocation3] sm:$0xff] (!%p583_p13)  ;;  %v584_v21 = vld [vmem:[#allocation9] ss:$0 sm:$0xff] (!%p583_p13)  ;;  %v585_v24 = vld [vmem:[#allocation9 + $0x1] ss:$0 sm:$0xff] (!%p583_p13)  ;;  %vm422_vm3 = vcmask (!%p583_p13), 257024  }
 0x198   : > { %377 = sbr.rel (%p583_p13) target bundleno = 417 (0x1a1), region = 68  ;;  %v379_v22 = vld [vmem:[#allocation3 + $0x8] sm:$0xff] (!%p583_p13)  ;;  %v410_v23 = vadd.f32 (!%p583_p13), %v584_v21, %v378_v20  ;;  %v380_v25 = vld [vmem:[#allocation3 + $0x10] sm:$0xff] (!%p583_p13)  ;;  %v381_v29 = vld [vmem:[#allocation3 + $0x18] sm:$0xff] (!%p583_p13) }
 0x199   : > { %v586_v26 = vld [vmem:[#allocation9 + $0x2] ss:$0 sm:$0xff] (!%p583_p13)  ;;  %v411_v27 = vadd.f32 (!%p583_p13), %v585_v24, %v379_v22  ;;  %v587_v30 = vld [vmem:[#allocation9 + $0x3] ss:$0 sm:$0xff] (!%p583_p13) }
 0x19a   : > { %v412_v28 = vadd.f32 (!%p583_p13), %v586_v26, %v380_v25  ;;  %v414_v31 = vmax.f32 (!%p583_p13), %v410_v23, 0.0  ;;  %v413_v32 = vadd.f32 (!%p583_p13), %v587_v30, %v381_v29 }
 0x19b   : > { %v415_v33 = vmax.f32 (!%p583_p13), %v411_v27, 0.0 }
 0x19c   : > { %v416_v34 = vmax.f32 (!%p583_p13), %v412_v28, 0.0  ;;  %v418_v35 = vpack.c.bf16 (!%p583_p13), %v414_v31, %v414_v31  ;;  %v417_v36 = vmax.f32 (!%p583_p13), %v413_v32, 0.0 }
 0x19d   : > { %v419_v37 = vpack.c.bf16 (!%p583_p13), %v415_v33, %v415_v33 }
 0x19e   : > { %v420_v38 = vpack.c.bf16 (!%p583_p13), %v416_v34, %v416_v34  ;;  %423 = vst.msk [vmem:[%s1257_s9] sm:$0xf] (!%p583_p13), %vm422_vm3, %v418_v35  ;;  %v421_v39 = vpack.c.bf16 (!%p583_p13), %v417_v36, %v417_v36 }
 0x19f   : > { %424 = vst.msk [vmem:[%s1257_s9 + $0x4] sm:$0xf] %vm422_vm3, %v419_v37 }
 0x1a0   : > { %425 = vst.msk [vmem:[%s1257_s9 + $0x8] sm:$0xf] %vm422_vm3, %v420_v38  ;;  %426 = vst.msk [vmem:[%s1257_s9 + $0xc] sm:$0xf] %vm422_vm3, %v421_v39 }
 0x1a1 PF: > { %s594_s18 = sshll.u32 %s941_s19, 8  ;;  %s441_s26 = sshll.u32 %s1257_s9, 4  ;;  %s1290_s26 = int_to_ptr.vmem [resolvable:$true] %s441_s26 }
 0x1a2   : > { %s1287_s4 = scalar_lea.hbm %s1356_s3, %s594_s18  ;;  %s428_s27 = scalar_lea.sflag [#allocation6], %s1238_s2 }
 0x1a3   : > { %s823_s6 = scalar_lea.vmem %s1290_s26, 256  ;;  %p1392_p4 = scmp.ne.s32.totalorder %s1381_s12, 0 }
 0x1a4   : > { %p824_p6 = scmp.ne.s32.totalorder %s1290_s26, %s823_s6  ;;  %s965_s23 = smov [#allocation10]  }
 0x1a5   : > { %s827_s24 = sshll.u32 %s965_s23, 4  ;;  %s828_s24 = int_to_ptr.vmem [resolvable:$false] %s827_s24 }
 0x1a6   : > { %p825_p5 = pnand %p824_p6, %p1392_p4  ;;  %s829_s19 = scalar_lea.vmem %s828_s24, 512 }
 0x1a7   : > { %p830_p9 = scmp.lt.s32.totalorder %s1290_s26, %s828_s24  ;;  %p831_p8 = scmp.lt.s32.totalorder %s829_s19, %s823_s6 }
 0x1a8   : > { %p826_p1 = pneg %p825_p5 }
 0x1a9   : > { %p832_p7 = por %p831_p8, %p830_p9 }
 0x1ab   : > { %p833_p0 = pnand %p832_p7, %p826_p1 }
 0x1ad   : > { %836 = shalt.err (!%p833_p0)
}
 0x1ae   : > { %s837_s9 = scalar_lea.hbm %s1287_s4, 256  ;;  %s841_s17 = scalar_lea.hbm %s1356_s3, 512 }
 0x1af   : > { %p838_p2 = scmp.ne.s32.totalorder %s1287_s4, %s837_s9  ;;  %p842_p10 = scmp.lt.u32.totalorder %s1287_s4, %s1356_s3 }
 0x1b0   : > { %p843_p12 = scmp.lt.u32.totalorder %s841_s17, %s837_s9  ;;  %p845_p6 = scmp.lt.u32.totalorder %s837_s9, %s1287_s4 }
 0x1b1   : > { %p839_p3 = pnand %p838_p2, %p1392_p4 }
 0x1b2   : > { %p844_p13 = por %p843_p12, %p842_p10 }
 0x1b3   : > { %p840_p11 = pneg %p839_p3 }
 0x1b4   : > { %p846_p5 = por %p845_p6, %p844_p13 }
 0x1b6   : > { %p847_p1 = pnand %p846_p5, %p840_p11 }
 0x1b8   : > { %850 = shalt.err (!%p847_p1)
}
 0x1b9   : > { %s966_s7 = smov 64   ;;  %s967_s21 = smov 4  }
 0x1ba   : > { %614 = dma.vmem_to_hbm [thread:$0]  (%p1392_p4), %s1290_s26, 256, %s1287_s4, %s428_s27, %s966_s7, %s966_s7, %s967_s21  }
 0x1bb PF: > { %p634_p9 = scmp.ge.s32.totalorder %s953_s22, 2  ;;  %s456_s8 = sand.u32 1, %s925_s15  }
 0x1bc   : > { %p1393_p8 = scmp.ne.s32.totalorder %s1382_s28, 0  ;;  %s457_s18 = scalar_lea.sflag [#allocation6], %s456_s8 }
 0x1be   : > { %p628_p7 = pnand %p634_p9, %p1393_p8 }
 0x1c0   : > { %908 = dma.done.wait (!%p628_p7), %s457_s18, 256  }
 0x1c1   : > { %910 = vsyncadd (!%p628_p7), %s457_s18, 4294967040  ;;  %s22_s22 = sadd.s32 1, %s953_s22   ;;  %s1394_s2 = sld [smem:[#allocation15_spill]] }
 0x1c2   : > { %p19_p0 = scmp.ge.s32.totalorder %s22_s22, 50   ;;  %s1395_s17 = sld [smem:[#allocation19_spill]] }
 0x1c3   : > { %s1396_s19 = sld [smem:[#allocation16_spill]]  ;;  %s1397_s0 = sld [smem:[#allocation17_spill]] }
 0x1c4   : > { %s1398_s21 = sld [smem:[#allocation18_spill]]  ;;  %s1399_s12 = smov %s917_s13 }
 0x1c5   : > { %s1400_s13 = smov %s921_s14  ;;  %s1401_s14 = smov %s1129_s10 }
 0x1c6   : > { %s1402_s15 = smov %s929_s16  ;;  %s1404_s18 = smov %s945_s20 }
 0x1c7   : > { %s1403_s16 = smov %s1394_s2  ;;  %21 = sbr.rel (!%p19_p0) target bundleno = 14 (0xe), region = 122 }
 0x1c9   : > { %s1405_s20 = smov %s1397_s0 }
 0x1ce   :  { %462 = vsyncpa [#allocation5], 1 }
 0x1cf   :  { %464 = vsyncpa [#allocation5 + $0x1], 1 }
 0x1d0   :  { %465 = vsyncpa [#allocation8], 1 }
 0x1d1   :  { %467 = vsyncpa [#allocation8 + $0x1], 1 }
 0x1d2   :  { %468 = vsyncpa [#allocation6], 1 }
 0x1d3   :  { %470 = vsyncpa [#allocation6 + $0x1], 1 }

</bundles_post_ra>
